<compile_context>
chip_gen: v7x
topology: tpu7x:2x2x1
jax: 0.10.0
libtpu: 0.0.40
codegen_flags: <defaults>
</compile_context>

<pallas_src>
import jax
import jax.numpy as jnp
import numpy as np
from jax.experimental import pallas as pl
from jax.experimental.pallas import tpu as pltpu


def asset_scoring_kernel(
    x_ref,      # (3*TB*N, F)  last-3-timestep slab, rows ordered (tap k, batch b, asset n)
    w_fe_ref,   # (F, H)       feature_extractor Linear
    w_hh_ref,   # (7, H, H)    [conv_k0, conv_k1, conv_k2, w1a, w1b, w_gcn, w_s1]
    bias_ref,   # (9, H)       [b_fe, b_conv, bn_scale, bn_shift, b1, b_gcn, b_s1, w2_row, b_s2_row]
    w_s2_ref,   # (H, 1)       score_mlp Linear(H, 1) weight, transposed
    adj_ref,    # (N, N)       combined adjacency (eye + softmax(adaptive))
    out_ref,    # (TB*N, 1)
):
    tbn = out_ref.shape[0]
    n = adj_ref.shape[0]
    tb = tbn // n
    h = w_fe_ref.shape[1]
    f32 = jnp.float32

    b_fe   = bias_ref[0:1, :]
    b_conv = bias_ref[1:2, :]
    bn_sc  = bias_ref[2:3, :]
    bn_sh  = bias_ref[3:4, :]
    b1     = bias_ref[4:5, :]
    b_gcn  = bias_ref[5:6, :]
    b_s1   = bias_ref[6:7, :]
    w2_row = bias_ref[7:8, :]
    b_s2   = bias_ref[8:9, 0:1]

    # ---- feature extractor, fused over the 3 surviving time taps -----------
    feat = jnp.maximum(
        jnp.dot(x_ref[...], w_fe_ref[...], preferred_element_type=f32) + b_fe,
        0.0)                                                       # (3*TBN, H)

    # ---- temporal conv at the last kept output position --------------------
    # Output position W-1 of Conv1d(k=3, padding=2) (after the [:, :-2] trim)
    # sees inputs x[W-3+k] with tap k; taps run on the full batch slab.
    conv = b_conv
    for k in range(3):
        conv = conv + jnp.dot(feat[k * tbn:(k + 1) * tbn], w_hh_ref[k],
                              preferred_element_type=f32)          # (TBN, H)
    asset = jnp.maximum(conv * bn_sc + bn_sh, 0.0)                 # BN(eval)+ReLU

    # ---- spatial attention: slab projections + per-batch pairwise part -----
    a_i = jnp.dot(asset, w_hh_ref[3], preferred_element_type=f32) + b1
    a_j = jnp.dot(asset, w_hh_ref[4], preferred_element_type=f32)
    adj = adj_ref[...]
    w2b = jnp.broadcast_to(w2_row.reshape(1, 1, h), (n, n, h))     # hoisted

    pieces = []
    for b in range(tb):                                            # static unroll
        lo = b * n
        ai_b = a_i[lo:lo + n]
        aj_b = a_j[lo:lo + n]
        as_b = asset[lo:lo + n]
        hidden = jnp.maximum(ai_b[:, None, :] + aj_b[None, :, :], 0.0)  # (N,N,H)
        logits = jnp.sum(hidden * w2b, axis=-1)                    # (N, N)
        # (+b2 omitted: softmax is shift-invariant, so it cancels exactly.)
        m = jnp.max(logits, axis=-1, keepdims=True)
        e = jnp.exp(logits - m)
        attn = e * pl.reciprocal(jnp.sum(e, axis=-1, keepdims=True),
                                 approx=True)
        upd = jnp.dot(attn, as_b, preferred_element_type=f32)      # (N, H)
        pieces.append(jnp.dot(adj, upd, preferred_element_type=f32))
    support = pieces[0] if tb == 1 else jnp.concatenate(pieces, axis=0)  # (TBN,H)

    # ---- GCN mlp + score MLP on the slab ------------------------------------
    gcn = jnp.dot(support, w_hh_ref[5], preferred_element_type=f32) + b_gcn
    s1 = jnp.maximum(
        jnp.dot(gcn, w_hh_ref[6], preferred_element_type=f32) + b_s1, 0.0)
    out_ref[...] = jnp.dot(s1, w_s2_ref[...],
                           preferred_element_type=f32) + b_s2      # (TBN, 1)


def asset_scoring_forward(x, params, combined_adj, tb=None):
    """x: (B, W, N, F) float32.  Returns (B, N) asset scores (eval mode)."""
    B, W, N, F = x.shape
    H = params["w_fe"].shape[1]
    assert W >= 3, "window_size must be >= 3 (Conv1d kernel size)"

    if tb is None:
        # Largest divisor of B with a modest slab; for small B this folds the
        # whole batch into one grid step.  (On v7x one may prefer B//tb >= 2 so
        # both TensorCores get work; at B=2 occupancy wins.)
        tb = 1
        for d in range(1, B + 1):
            if B % d == 0 and d * N <= 512:
                tb = d
    assert B % tb == 0
    G = B // tb
    TBN = tb * N

    # Only time steps W-3..W-1 feed features[:, :, -1, :]; slice them here so
    # the kernel never DMAs the rest of the window.  Rows within a grid block
    # are ordered (tap k, local batch b, asset n).
    x3 = x[:, W - 3:W]                                       # (B, 3, N, F)
    x3 = x3.reshape(G, tb, 3, N, F).transpose(0, 2, 1, 3, 4)  # (G, 3, tb, N, F)
    x_fe = x3.reshape(G * 3 * TBN, F)

    # Pack the many small parameters into a few operands (fewer, larger DMAs).
    w_stack = jnp.concatenate(
        [params["w_conv"],
         jnp.stack([params["w1a"], params["w1b"],
                    params["w_gcn"], params["w_s1"]], axis=0)],
        axis=0)                                               # (7, H, H)
    bias_pack = jnp.concatenate(
        [params["b_fe"], params["b_conv"], params["bn_scale"],
         params["bn_shift"], params["b1"], params["b_gcn"], params["b_s1"],
         params["w2"], jnp.broadcast_to(params["b_s2"], (1, H))],
        axis=0)                                               # (9, H)
    w_s2t = params["w_s2"].T                                  # (H, 1)

    out = pl.pallas_call(
        asset_scoring_kernel,
        out_shape=jax.ShapeDtypeStruct((B * N, 1), jnp.float32),
        grid=(G,),
        in_specs=[
            pl.BlockSpec((3 * TBN, F), lambda g: (g, 0)),     # x slab
            pl.BlockSpec((F, H), lambda g: (0, 0)),           # w_fe
            pl.BlockSpec((7, H, H), lambda g: (0, 0, 0)),     # weight stack
            pl.BlockSpec((9, H), lambda g: (0, 0)),           # bias/scale pack
            pl.BlockSpec((H, 1), lambda g: (0, 0)),           # w_s2^T
            pl.BlockSpec((N, N), lambda g: (0, 0)),           # adjacency
        ],
        out_specs=pl.BlockSpec((TBN, 1), lambda g: (g, 0)),
        compiler_params=pltpu.CompilerParams(
            dimension_semantics=("parallel",)),
    )(x_fe, params["w_fe"], w_stack, bias_pack, w_s2t, combined_adj)
    return out.reshape(B, N)


def make_params(key, F, H, N):
    ks = list(jax.random.split(key, 16))

    def glorot(k, shape):
        fan_in, fan_out = shape[-2], shape[-1]
        lim = float(np.sqrt(6.0 / (fan_in + fan_out)))
        return jax.random.uniform(k, shape, jnp.float32, -lim, lim)

    def bias(k, shape, fan_in):
        lim = float(1.0 / np.sqrt(fan_in))
        return jax.random.uniform(k, shape, jnp.float32, -lim, lim)

    bn_eps = 1e-5
    params = {
        "w_fe": glorot(ks[0], (F, H)),
        "b_fe": bias(ks[1], (1, H), F),
        "w_conv": glorot(ks[2], (3, H, H)),       # [tap, c_in, c_out]
        "b_conv": bias(ks[3], (1, H), 3 * H),
        # BatchNorm1d eval-mode fold: default running_mean=0, running_var=1,
        # gamma=1, beta=0  ->  scale = 1/sqrt(1+eps), shift = 0.
        "bn_scale": jnp.full((1, H), 1.0 / np.sqrt(1.0 + bn_eps), jnp.float32),
        "bn_shift": jnp.zeros((1, H), jnp.float32),
        "w1a": glorot(ks[4], (H, H)),
        "w1b": glorot(ks[5], (H, H)),
        "b1": bias(ks[6], (1, H), 2 * H),
        "w2": glorot(ks[7], (1, H)),
        "b2": bias(ks[8], (1, 1), H),
        "w_gcn": glorot(ks[9], (H, H)),
        "b_gcn": bias(ks[10], (1, H), H),
        "w_s1": glorot(ks[11], (H, H)),
        "b_s1": bias(ks[12], (1, H), H),
        "w_s2": glorot(ks[13], (1, H)),
        "b_s2": bias(ks[14], (1, 1), H),
    }
    # relation_matrix=None -> adj_matrix = eye(N); adaptive adjacency is
    # symmetrized, row-softmaxed and added (parameter-only glue done here).
    adaptive = glorot(ks[15], (N, N))
    sym = 0.5 * (adaptive + adaptive.T)
    combined_adj = jnp.eye(N, dtype=jnp.float32) + jax.nn.softmax(sym, axis=1)
    return params, combined_adj


def reference_forward(x, params, combined_adj):
    """Pure-JAX f32 reference with the module's eval-mode forward semantics."""
    B, W, N, F = x.shape
    feat = jax.nn.relu(
        jnp.einsum("bwnf,fh->bwnh", x, params["w_fe"]) + params["b_fe"][0])
    conv = params["b_conv"][0]
    for k in range(3):
        conv = conv + jnp.einsum("bnh,hk->bnk",
                                 feat[:, W - 3 + k], params["w_conv"][k])
    asset = jax.nn.relu(conv * params["bn_scale"][0] + params["bn_shift"][0])
    a_i = jnp.einsum("bnh,hk->bnk", asset, params["w1a"]) + params["b1"][0]
    a_j = jnp.einsum("bnh,hk->bnk", asset, params["w1b"])
    hidden = jax.nn.relu(a_i[:, :, None, :] + a_j[:, None, :, :])
    logits = jnp.sum(hidden * params["w2"][0], axis=-1) + params["b2"][0, 0]
    attn = jax.nn.softmax(logits, axis=-1)
    asset = jnp.einsum("bij,bjh->bih", attn, asset)
    support = jnp.einsum("ij,bjh->bih", combined_adj, asset)
    gcn = jnp.einsum("bnh,hk->bnk", support, params["w_gcn"]) + params["b_gcn"][0]
    s1 = jax.nn.relu(
        jnp.einsum("bnh,hk->bnk", gcn, params["w_s1"]) + params["b_s1"][0])
    return jnp.sum(s1 * params["w_s2"][0], axis=-1) + params["b_s2"][0, 0]


if __name__ == "__main__":
    # small shapes consistent with the module's forward:
    # batch=2, window=8, num_assets=8, stock_feature_dim=8, hidden_dim=32
    B, W, N, F, H = 2, 8, 8, 8, 32
    key = jax.random.PRNGKey(0)
    kx, kp = jax.random.split(key)
    x = jax.random.normal(kx, (B, W, N, F), dtype=jnp.float32)
    params, combined_adj = make_params(kp, F, H, N)

    scores = asset_scoring_forward(x, params, combined_adj)
    scores = jax.block_until_ready(scores)

    ref = reference_forward(x, params, combined_adj)
    np.testing.assert_allclose(np.asarray(scores), np.asarray(ref),
                               rtol=2e-2, atol=2e-2)
    print("KERNEL_OK")
</pallas_src>

<mosaic_0001>
module attributes {stable_mosaic.version = 11 : i64} {
  func.func @asset_scoring_kernel(%arg0: i32, %arg1: memref<48x8xf32, #tpu.memory_space<vmem>>, %arg2: memref<8x32xf32, #tpu.memory_space<vmem>>, %arg3: memref<7x32x32xf32, #tpu.memory_space<vmem>>, %arg4: memref<9x32xf32, #tpu.memory_space<vmem>>, %arg5: memref<32x1xf32, #tpu.memory_space<vmem>>, %arg6: memref<8x8xf32, #tpu.memory_space<vmem>>, %arg7: memref<16x1xf32, #tpu.memory_space<vmem>>) attributes {dimension_semantics = [#tpu.dimension_semantics<parallel>], iteration_bounds = array<i64: 1>, scalar_prefetch = 0 : i64, scratch_operands = 0 : i64, tpu.core_type = #tpu.core_type<tc>, window_params = [{transform_indices = @transform_0, window_bounds = array<i64: 48, 8>}, {pipeline_mode = #tpu.pipeline_mode<synchronous>, transform_indices = @transform_1, window_bounds = array<i64: 8, 32>}, {pipeline_mode = #tpu.pipeline_mode<synchronous>, transform_indices = @transform_2, window_bounds = array<i64: 7, 32, 32>}, {pipeline_mode = #tpu.pipeline_mode<synchronous>, transform_indices = @transform_3, window_bounds = array<i64: 9, 32>}, {pipeline_mode = #tpu.pipeline_mode<synchronous>, transform_indices = @transform_4, window_bounds = array<i64: 32, 1>}, {pipeline_mode = #tpu.pipeline_mode<synchronous>, transform_indices = @transform_5, window_bounds = array<i64: 8, 8>}, {transform_indices = @transform_6, window_bounds = array<i64: 16, 1>}]} {
    %c0 = arith.constant 0 : index
    %c0_0 = arith.constant 0 : index
    %0 = vector.load %arg4[%c0, %c0_0] : memref<9x32xf32, #tpu.memory_space<vmem>>, vector<1x32xf32>
    %c1 = arith.constant 1 : index
    %c0_1 = arith.constant 0 : index
    %1 = vector.load %arg4[%c1, %c0_1] : memref<9x32xf32, #tpu.memory_space<vmem>>, vector<1x32xf32>
    %c2 = arith.constant 2 : index
    %c0_2 = arith.constant 0 : index
    %2 = vector.load %arg4[%c2, %c0_2] : memref<9x32xf32, #tpu.memory_space<vmem>>, vector<1x32xf32>
    %c3 = arith.constant 3 : index
    %c0_3 = arith.constant 0 : index
    %3 = vector.load %arg4[%c3, %c0_3] : memref<9x32xf32, #tpu.memory_space<vmem>>, vector<1x32xf32>
    %c4 = arith.constant 4 : index
    %c0_4 = arith.constant 0 : index
    %4 = vector.load %arg4[%c4, %c0_4] : memref<9x32xf32, #tpu.memory_space<vmem>>, vector<1x32xf32>
    %c5 = arith.constant 5 : index
    %c0_5 = arith.constant 0 : index
    %5 = vector.load %arg4[%c5, %c0_5] : memref<9x32xf32, #tpu.memory_space<vmem>>, vector<1x32xf32>
    %c6 = arith.constant 6 : index
    %c0_6 = arith.constant 0 : index
    %6 = vector.load %arg4[%c6, %c0_6] : memref<9x32xf32, #tpu.memory_space<vmem>>, vector<1x32xf32>
    %c7 = arith.constant 7 : index
    %c0_7 = arith.constant 0 : index
    %7 = vector.load %arg4[%c7, %c0_7] : memref<9x32xf32, #tpu.memory_space<vmem>>, vector<1x32xf32>
    %c8 = arith.constant 8 : index
    %c0_8 = arith.constant 0 : index
    %8 = vector.load %arg4[%c8, %c0_8] : memref<9x32xf32, #tpu.memory_space<vmem>>, vector<1x1xf32>
    %c0_9 = arith.constant 0 : index
    %c0_10 = arith.constant 0 : index
    %9 = vector.load %arg1[%c0_9, %c0_10] : memref<48x8xf32, #tpu.memory_space<vmem>>, vector<48x8xf32>
    %c0_11 = arith.constant 0 : index
    %c0_12 = arith.constant 0 : index
    %10 = vector.load %arg2[%c0_11, %c0_12] : memref<8x32xf32, #tpu.memory_space<vmem>>, vector<8x32xf32>
    %cst = arith.constant dense<0.000000e+00> : vector<48x32xf32>
    %11 = tpu.matmul %9, %10, %cst {dimension_numbers = #tpu.dot_dimension_numbers<[1], [0], [0], [1], [0, 0, 1, 1], [], []>} : vector<48x8xf32>, vector<8x32xf32>, vector<48x32xf32> -> vector<48x32xf32>
    %12 = vector.broadcast %0 : vector<1x32xf32> to vector<48x32xf32>
    %13 = arith.addf %11, %12 : vector<48x32xf32>
    %cst_13 = arith.constant 0.000000e+00 : f32
    %14 = vector.broadcast %cst_13 : f32 to vector<48x32xf32>
    %15 = arith.maximumf %13, %14 : vector<48x32xf32>
    %16 = vector.extract_strided_slice %15 {offsets = [0, 0], sizes = [16, 32], strides = [1, 1]} : vector<48x32xf32> to vector<16x32xf32>
    %c0_14 = arith.constant 0 : index
    %c0_15 = arith.constant 0 : index
    %c0_16 = arith.constant 0 : index
    %17 = vector.load %arg3[%c0_14, %c0_15, %c0_16] : memref<7x32x32xf32, #tpu.memory_space<vmem>>, vector<1x32x32xf32>
    %18 = vector.shape_cast %17 : vector<1x32x32xf32> to vector<32x32xf32>
    %cst_17 = arith.constant dense<0.000000e+00> : vector<16x32xf32>
    %19 = tpu.matmul %16, %18, %cst_17 {dimension_numbers = #tpu.dot_dimension_numbers<[1], [0], [0], [1], [0, 0, 1, 1], [], []>} : vector<16x32xf32>, vector<32x32xf32>, vector<16x32xf32> -> vector<16x32xf32>
    %20 = vector.broadcast %1 : vector<1x32xf32> to vector<16x32xf32>
    %21 = arith.addf %20, %19 : vector<16x32xf32>
    %22 = vector.extract_strided_slice %15 {offsets = [16, 0], sizes = [16, 32], strides = [1, 1]} : vector<48x32xf32> to vector<16x32xf32>
    %c1_18 = arith.constant 1 : index
    %c0_19 = arith.constant 0 : index
    %c0_20 = arith.constant 0 : index
    %23 = vector.load %arg3[%c1_18, %c0_19, %c0_20] : memref<7x32x32xf32, #tpu.memory_space<vmem>>, vector<1x32x32xf32>
    %24 = vector.shape_cast %23 : vector<1x32x32xf32> to vector<32x32xf32>
    %cst_21 = arith.constant dense<0.000000e+00> : vector<16x32xf32>
    %25 = tpu.matmul %22, %24, %cst_21 {dimension_numbers = #tpu.dot_dimension_numbers<[1], [0], [0], [1], [0, 0, 1, 1], [], []>} : vector<16x32xf32>, vector<32x32xf32>, vector<16x32xf32> -> vector<16x32xf32>
    %26 = arith.addf %21, %25 : vector<16x32xf32>
    %27 = vector.extract_strided_slice %15 {offsets = [32, 0], sizes = [16, 32], strides = [1, 1]} : vector<48x32xf32> to vector<16x32xf32>
    %c2_22 = arith.constant 2 : index
    %c0_23 = arith.constant 0 : index
    %c0_24 = arith.constant 0 : index
    %28 = vector.load %arg3[%c2_22, %c0_23, %c0_24] : memref<7x32x32xf32, #tpu.memory_space<vmem>>, vector<1x32x32xf32>
    %29 = vector.shape_cast %28 : vector<1x32x32xf32> to vector<32x32xf32>
    %cst_25 = arith.constant dense<0.000000e+00> : vector<16x32xf32>
    %30 = tpu.matmul %27, %29, %cst_25 {dimension_numbers = #tpu.dot_dimension_numbers<[1], [0], [0], [1], [0, 0, 1, 1], [], []>} : vector<16x32xf32>, vector<32x32xf32>, vector<16x32xf32> -> vector<16x32xf32>
    %31 = arith.addf %26, %30 : vector<16x32xf32>
    %32 = vector.broadcast %2 : vector<1x32xf32> to vector<16x32xf32>
    %33 = arith.mulf %31, %32 : vector<16x32xf32>
    %34 = vector.broadcast %3 : vector<1x32xf32> to vector<16x32xf32>
    %35 = arith.addf %33, %34 : vector<16x32xf32>
    %cst_26 = arith.constant 0.000000e+00 : f32
    %36 = vector.broadcast %cst_26 : f32 to vector<16x32xf32>
    %37 = arith.maximumf %35, %36 : vector<16x32xf32>
    %c3_27 = arith.constant 3 : index
    %c0_28 = arith.constant 0 : index
    %c0_29 = arith.constant 0 : index
    %38 = vector.load %arg3[%c3_27, %c0_28, %c0_29] : memref<7x32x32xf32, #tpu.memory_space<vmem>>, vector<1x32x32xf32>
    %39 = vector.shape_cast %38 : vector<1x32x32xf32> to vector<32x32xf32>
    %cst_30 = arith.constant dense<0.000000e+00> : vector<16x32xf32>
    %40 = tpu.matmul %37, %39, %cst_30 {dimension_numbers = #tpu.dot_dimension_numbers<[1], [0], [0], [1], [0, 0, 1, 1], [], []>} : vector<16x32xf32>, vector<32x32xf32>, vector<16x32xf32> -> vector<16x32xf32>
    %41 = vector.broadcast %4 : vector<1x32xf32> to vector<16x32xf32>
    %42 = arith.addf %40, %41 : vector<16x32xf32>
    %c4_31 = arith.constant 4 : index
    %c0_32 = arith.constant 0 : index
    %c0_33 = arith.constant 0 : index
    %43 = vector.load %arg3[%c4_31, %c0_32, %c0_33] : memref<7x32x32xf32, #tpu.memory_space<vmem>>, vector<1x32x32xf32>
    %44 = vector.shape_cast %43 : vector<1x32x32xf32> to vector<32x32xf32>
    %cst_34 = arith.constant dense<0.000000e+00> : vector<16x32xf32>
    %45 = tpu.matmul %37, %44, %cst_34 {dimension_numbers = #tpu.dot_dimension_numbers<[1], [0], [0], [1], [0, 0, 1, 1], [], []>} : vector<16x32xf32>, vector<32x32xf32>, vector<16x32xf32> -> vector<16x32xf32>
    %c0_35 = arith.constant 0 : index
    %c0_36 = arith.constant 0 : index
    %46 = vector.load %arg6[%c0_35, %c0_36] : memref<8x8xf32, #tpu.memory_space<vmem>>, vector<8x8xf32>
    %47 = vector.shape_cast %7 : vector<1x32xf32> to vector<1x1x32xf32>
    %48 = vector.shape_cast %47 : vector<1x1x32xf32> to vector<1x1x32xf32>
    %49 = vector.broadcast %48 : vector<1x1x32xf32> to vector<8x8x32xf32>
    %50 = vector.extract_strided_slice %42 {offsets = [0, 0], sizes = [8, 32], strides = [1, 1]} : vector<16x32xf32> to vector<8x32xf32>
    %51 = vector.extract_strided_slice %45 {offsets = [0, 0], sizes = [8, 32], strides = [1, 1]} : vector<16x32xf32> to vector<8x32xf32>
    %52 = vector.extract_strided_slice %37 {offsets = [0, 0], sizes = [8, 32], strides = [1, 1]} : vector<16x32xf32> to vector<8x32xf32>
    %53 = vector.shape_cast %50 : vector<8x32xf32> to vector<8x1x32xf32>
    %54 = vector.shape_cast %51 : vector<8x32xf32> to vector<1x8x32xf32>
    %55 = vector.broadcast %53 : vector<8x1x32xf32> to vector<8x8x32xf32>
    %56 = vector.broadcast %54 : vector<1x8x32xf32> to vector<8x8x32xf32>
    %57 = arith.addf %55, %56 : vector<8x8x32xf32>
    %cst_37 = arith.constant 0.000000e+00 : f32
    %58 = vector.broadcast %cst_37 : f32 to vector<8x8x32xf32>
    %59 = arith.maximumf %57, %58 : vector<8x8x32xf32>
    %60 = arith.mulf %59, %49 : vector<8x8x32xf32>
    %cst_38 = arith.constant dense<0.000000e+00> : vector<8x8xf32>
    %61 = vector.multi_reduction <add>, %60, %cst_38 [2] : vector<8x8x32xf32> to vector<8x8xf32>
    %cst_39 = arith.constant dense<0xFF800000> : vector<8xf32>
    %62 = vector.multi_reduction <maximumf>, %61, %cst_39 [1] : vector<8x8xf32> to vector<8xf32>
    %63 = vector.shape_cast %62 : vector<8xf32> to vector<8x1xf32>
    %64 = vector.broadcast %63 : vector<8x1xf32> to vector<8x8xf32>
    %65 = arith.subf %61, %64 : vector<8x8xf32>
    %66 = math.exp %65 : vector<8x8xf32>
    %cst_40 = arith.constant dense<0.000000e+00> : vector<8xf32>
    %67 = vector.multi_reduction <add>, %66, %cst_40 [1] : vector<8x8xf32> to vector<8xf32>
    %68 = vector.shape_cast %67 : vector<8xf32> to vector<8x1xf32>
    %69 = tpu.reciprocal %68 {approx = true} : vector<8x1xf32> -> vector<8x1xf32>
    %70 = vector.broadcast %69 : vector<8x1xf32> to vector<8x8xf32>
    %71 = arith.mulf %66, %70 : vector<8x8xf32>
    %cst_41 = arith.constant dense<0.000000e+00> : vector<8x32xf32>
    %72 = tpu.matmul %71, %52, %cst_41 {dimension_numbers = #tpu.dot_dimension_numbers<[1], [0], [0], [1], [0, 0, 1, 1], [], []>} : vector<8x8xf32>, vector<8x32xf32>, vector<8x32xf32> -> vector<8x32xf32>
    %cst_42 = arith.constant dense<0.000000e+00> : vector<8x32xf32>
    %73 = tpu.matmul %46, %72, %cst_42 {dimension_numbers = #tpu.dot_dimension_numbers<[1], [0], [0], [1], [0, 0, 1, 1], [], []>} : vector<8x8xf32>, vector<8x32xf32>, vector<8x32xf32> -> vector<8x32xf32>
    %74 = vector.extract_strided_slice %42 {offsets = [8, 0], sizes = [8, 32], strides = [1, 1]} : vector<16x32xf32> to vector<8x32xf32>
    %75 = vector.extract_strided_slice %45 {offsets = [8, 0], sizes = [8, 32], strides = [1, 1]} : vector<16x32xf32> to vector<8x32xf32>
    %76 = vector.extract_strided_slice %37 {offsets = [8, 0], sizes = [8, 32], strides = [1, 1]} : vector<16x32xf32> to vector<8x32xf32>
    %77 = vector.shape_cast %74 : vector<8x32xf32> to vector<8x1x32xf32>
    %78 = vector.shape_cast %75 : vector<8x32xf32> to vector<1x8x32xf32>
    %79 = vector.broadcast %77 : vector<8x1x32xf32> to vector<8x8x32xf32>
    %80 = vector.broadcast %78 : vector<1x8x32xf32> to vector<8x8x32xf32>
    %81 = arith.addf %79, %80 : vector<8x8x32xf32>
    %cst_43 = arith.constant 0.000000e+00 : f32
    %82 = vector.broadcast %cst_43 : f32 to vector<8x8x32xf32>
    %83 = arith.maximumf %81, %82 : vector<8x8x32xf32>
    %84 = arith.mulf %83, %49 : vector<8x8x32xf32>
    %cst_44 = arith.constant dense<0.000000e+00> : vector<8x8xf32>
    %85 = vector.multi_reduction <add>, %84, %cst_44 [2] : vector<8x8x32xf32> to vector<8x8xf32>
    %cst_45 = arith.constant dense<0xFF800000> : vector<8xf32>
    %86 = vector.multi_reduction <maximumf>, %85, %cst_45 [1] : vector<8x8xf32> to vector<8xf32>
    %87 = vector.shape_cast %86 : vector<8xf32> to vector<8x1xf32>
    %88 = vector.broadcast %87 : vector<8x1xf32> to vector<8x8xf32>
    %89 = arith.subf %85, %88 : vector<8x8xf32>
    %90 = math.exp %89 : vector<8x8xf32>
    %cst_46 = arith.constant dense<0.000000e+00> : vector<8xf32>
    %91 = vector.multi_reduction <add>, %90, %cst_46 [1] : vector<8x8xf32> to vector<8xf32>
    %92 = vector.shape_cast %91 : vector<8xf32> to vector<8x1xf32>
    %93 = tpu.reciprocal %92 {approx = true} : vector<8x1xf32> -> vector<8x1xf32>
    %94 = vector.broadcast %93 : vector<8x1xf32> to vector<8x8xf32>
    %95 = arith.mulf %90, %94 : vector<8x8xf32>
    %cst_47 = arith.constant dense<0.000000e+00> : vector<8x32xf32>
    %96 = tpu.matmul %95, %76, %cst_47 {dimension_numbers = #tpu.dot_dimension_numbers<[1], [0], [0], [1], [0, 0, 1, 1], [], []>} : vector<8x8xf32>, vector<8x32xf32>, vector<8x32xf32> -> vector<8x32xf32>
    %cst_48 = arith.constant dense<0.000000e+00> : vector<8x32xf32>
    %97 = tpu.matmul %46, %96, %cst_48 {dimension_numbers = #tpu.dot_dimension_numbers<[1], [0], [0], [1], [0, 0, 1, 1], [], []>} : vector<8x8xf32>, vector<8x32xf32>, vector<8x32xf32> -> vector<8x32xf32>
    %98 = tpu.concatenate %73, %97 in 0 : vector<8x32xf32>, vector<8x32xf32> -> vector<16x32xf32>
    %c5_49 = arith.constant 5 : index
    %c0_50 = arith.constant 0 : index
    %c0_51 = arith.constant 0 : index
    %99 = vector.load %arg3[%c5_49, %c0_50, %c0_51] : memref<7x32x32xf32, #tpu.memory_space<vmem>>, vector<1x32x32xf32>
    %100 = vector.shape_cast %99 : vector<1x32x32xf32> to vector<32x32xf32>
    %cst_52 = arith.constant dense<0.000000e+00> : vector<16x32xf32>
    %101 = tpu.matmul %98, %100, %cst_52 {dimension_numbers = #tpu.dot_dimension_numbers<[1], [0], [0], [1], [0, 0, 1, 1], [], []>} : vector<16x32xf32>, vector<32x32xf32>, vector<16x32xf32> -> vector<16x32xf32>
    %102 = vector.broadcast %5 : vector<1x32xf32> to vector<16x32xf32>
    %103 = arith.addf %101, %102 : vector<16x32xf32>
    %c6_53 = arith.constant 6 : index
    %c0_54 = arith.constant 0 : index
    %c0_55 = arith.constant 0 : index
    %104 = vector.load %arg3[%c6_53, %c0_54, %c0_55] : memref<7x32x32xf32, #tpu.memory_space<vmem>>, vector<1x32x32xf32>
    %105 = vector.shape_cast %104 : vector<1x32x32xf32> to vector<32x32xf32>
    %cst_56 = arith.constant dense<0.000000e+00> : vector<16x32xf32>
    %106 = tpu.matmul %103, %105, %cst_56 {dimension_numbers = #tpu.dot_dimension_numbers<[1], [0], [0], [1], [0, 0, 1, 1], [], []>} : vector<16x32xf32>, vector<32x32xf32>, vector<16x32xf32> -> vector<16x32xf32>
    %107 = vector.broadcast %6 : vector<1x32xf32> to vector<16x32xf32>
    %108 = arith.addf %106, %107 : vector<16x32xf32>
    %cst_57 = arith.constant 0.000000e+00 : f32
    %109 = vector.broadcast %cst_57 : f32 to vector<16x32xf32>
    %110 = arith.maximumf %108, %109 : vector<16x32xf32>
    %c0_58 = arith.constant 0 : index
    %c0_59 = arith.constant 0 : index
    %111 = vector.load %arg5[%c0_58, %c0_59] : memref<32x1xf32, #tpu.memory_space<vmem>>, vector<32x1xf32>
    %cst_60 = arith.constant dense<0.000000e+00> : vector<16x1xf32>
    %112 = tpu.matmul %110, %111, %cst_60 {dimension_numbers = #tpu.dot_dimension_numbers<[1], [0], [0], [1], [0, 0, 1, 1], [], []>} : vector<16x32xf32>, vector<32x1xf32>, vector<16x1xf32> -> vector<16x1xf32>
    %113 = vector.broadcast %8 : vector<1x1xf32> to vector<16x1xf32>
    %114 = arith.addf %112, %113 : vector<16x1xf32>
    %c0_61 = arith.constant 0 : index
    %c0_62 = arith.constant 0 : index
    %115 = vector.load %arg7[%c0_61, %c0_62] : memref<16x1xf32, #tpu.memory_space<vmem>>, vector<16x1xf32>
    tpu.vector_store %arg7[%c0_61, %c0_62], %114 {strides = array<i32>} : memref<16x1xf32, #tpu.memory_space<vmem>>, vector<16x1xf32>,
    return
  }
  func.func @transform_0(%arg0: i32) -> (i32, i32) {
    %c0_i32 = arith.constant 0 : i32
    %c0_i32_0 = arith.constant 0 : i32
    return %arg0, %c0_i32 : i32, i32
  }
  func.func @transform_1(%arg0: i32) -> (i32, i32) {
    %c0_i32 = arith.constant 0 : i32
    %c0_i32_0 = arith.constant 0 : i32
    %c0_i32_1 = arith.constant 0 : i32
    return %c0_i32, %c0_i32_0 : i32, i32
  }
  func.func @transform_2(%arg0: i32) -> (i32, i32, i32) {
    %c0_i32 = arith.constant 0 : i32
    %c0_i32_0 = arith.constant 0 : i32
    %c0_i32_1 = arith.constant 0 : i32
    %c0_i32_2 = arith.constant 0 : i32
    return %c0_i32, %c0_i32_0, %c0_i32_1 : i32, i32, i32
  }
  func.func @transform_3(%arg0: i32) -> (i32, i32) {
    %c0_i32 = arith.constant 0 : i32
    %c0_i32_0 = arith.constant 0 : i32
    %c0_i32_1 = arith.constant 0 : i32
    return %c0_i32, %c0_i32_0 : i32, i32
  }
  func.func @transform_4(%arg0: i32) -> (i32, i32) {
    %c0_i32 = arith.constant 0 : i32
    %c0_i32_0 = arith.constant 0 : i32
    %c0_i32_1 = arith.constant 0 : i32
    return %c0_i32, %c0_i32_0 : i32, i32
  }
  func.func @transform_5(%arg0: i32) -> (i32, i32) {
    %c0_i32 = arith.constant 0 : i32
    %c0_i32_0 = arith.constant 0 : i32
    %c0_i32_1 = arith.constant 0 : i32
    return %c0_i32, %c0_i32_0 : i32, i32
  }
  func.func @transform_6(%arg0: i32) -> (i32, i32) {
    %c0_i32 = arith.constant 0 : i32
    %c0_i32_0 = arith.constant 0 : i32
    return %arg0, %c0_i32 : i32, i32
  }
}

</mosaic_0001>

<bundles_post_ra>
// kernel: tpu_custom_call.1
= control target key start
LH: loop header
LB: loop body
LE: loop exit
PB: predicated region body
PF: predicated region fallthrough
CT: control target
= control target key end

     0   :  { %11 = vsyncpa [#allocation3], 0  ;;  %s2467_s21 = smov [#allocation2]   ;;  %s3001_s0 = inlined_call_operand.vmem [shape: f32[48,8], index: 0, kind: input, shape index: {}]   ;;  %s3002_s1 = inlined_call_operand.vmem [shape: f32[8,32], index: 1, kind: input, shape index: {}]   ;;  %s3003_s2 = inlined_call_operand.hbm [shape: f32[7,32,32], index: 2, kind: input, shape index: {}]   ;;  %s3004_s3 = inlined_call_operand.vmem [shape: f32[9,32], index: 3, kind: input, shape index: {}]   ;;  %s3005_s4 = inlined_call_operand.vmem [shape: f32[32,1], index: 4, kind: input, shape index: {}]   ;;  %s3006_s5 = inlined_call_operand.vmem [shape: f32[8,8], index: 5, kind: input, shape index: {}]   ;;  %s3007_s6 = inlined_call_operand.vmem [shape: f32[16,1], index: 6, kind: output, shape index: {}]  }
   0x1   :  { %s21_s22 = sshll.u32 %s2467_s21, 4  ;;  %s2443_s25 = scalar_lea.hbm %s3003_s2, 3584  ;;  %s22_s22 = int_to_ptr.vmem [resolvable:$true] %s21_s22 }
   0x2   :  { %p2444_p0 = scmp.ne.s32.totalorder %s3003_s2, %s2443_s25  ;;  %p2447_p1 = scmp.lt.u32.totalorder %s2443_s25, %s3003_s2 }
   0x4   :  { %p2449_p2 = pnand %p2447_p1, %p2444_p0 }
   0x6   :  { %2452 = shalt.err (!%p2449_p2)
}
   0x7   :  { %s2453_s30 = scalar_lea.vmem %s22_s22, 3584  ;;  %p2458_p4 = scmp.lt.s32.totalorder %s22_s22, %s22_s22 }
   0x8   :  { %p2454_p3 = scmp.ne.s32.totalorder %s22_s22, %s2453_s30  ;;  %p2459_p5 = scmp.lt.s32.totalorder %s2453_s30, %s2453_s30 }
   0xa   :  { %p2460_p6 = por %p2459_p5, %p2458_p4 }
   0xc   :  { %p2461_p7 = pnand %p2460_p6, %p2454_p3 }
   0xe   :  { %2464 = shalt.err (!%p2461_p7)
}
   0xf   :  { %s2468_s7 = smov 128   ;;  %s2469_s8 = smov 8  }
  0x10   :  { %27 = dma.hbm_to_vmem [thread:$0]  %s3003_s2, 3584, %s22_s22, [#allocation3], %s2468_s7, %s2468_s7, %s2469_s8  }
  0x11   :  { %2465 = dma.done.wait [#allocation3], 3584  }
  0x12   :  { %2466 = vsyncadd [#allocation3], 4294963712  ;;  %vm57_vm0 = vcmask 64512   ;;  %v52_v0 = vld [vmem:[%s3002_s1] sm:$0xff]  ;;  %v47_v2 = vld [vmem:[%s3001_s0 + $0x8] sm:$0xff]  ;;  %vm181_vm1 = vcmask 261120  }
  0x13   :  { %v46_v1 = vld [vmem:[%s3001_s0] sm:$0xff]  ;;  %2207 = vmatprep.subr.mxu0 %v52_v0  ;;  %v48_v3 = vld [vmem:[%s3001_s0 + $0x10] sm:$0xff]  ;;  %2390 = vmatprep.subr.mxu1 %v52_v0  ;;  %v51_v5 = vld [vmem:[%s3001_s0 + $0x28] sm:$0xff]  ;;  %v2470_v53 = vmov 0.0   ;;  %vm814_vm2 = vcmask 1041409   ;;  %vm816_vm3 = vcmask 1042434  }
  0x14   :  { %2209 = vmatprep.mubr.msk.f32.mxu0 %vm57_vm0, %v46_v1  ;;  %v50_v4 = vld [vmem:[%s3001_s0 + $0x20] sm:$0xff]  ;;  %2208 = vmatpush3.msra.mxu0 %v52_v0  ;;  %v178_v7 = vld [vmem:[#allocation2 + $0x8] sm:$0xff]  ;;  %v49_v9 = vld [vmem:[%s3001_s0 + $0x18] sm:$0xff]  ;;  %vm818_vm4 = vcmask 1043459   ;;  %vm822_vm5 = vcmask 1045509   ;;  %vm820_vm6 = vcmask 1044484  }
  0x15   :  { %v177_v6 = vld [vmem:[#allocation2] sm:$0xff]  ;;  %2210 = vmatmul.mubr.msk.f32.vlgmr.msra.gmra.mrb[0].mxu0 %vm57_vm0, %v47_v2  ;;  %2391 = vmatpush3.msra.mxu1 %v52_v0  ;;  %v179_v10 = vld [vmem:[#allocation2 + $0x10] sm:$0xff]  ;;  %v180_v11 = vld [vmem:[#allocation2 + $0x18] sm:$0xff]  ;;  %vm824_vm7 = vcmask 1046534   ;;  %vm826_vm8 = vcmask 1047559   ;;  %vm2473_vm9 = vmmov 0  }
  0x16   :  { %v2326_v8 = vpack.c.bf16 %v178_v7, %v177_v6  ;;  %2212 = vmatprep.mubr.msk.f32.mxu0 %vm57_vm0, %v48_v3  ;;  %2215 = vmatprep.mubr.msk.f32.mxu1 %vm57_vm0, %v50_v4  ;;  %v2330_v12 = vpack.c.bf16 %v180_v11, %v179_v10  ;;  %v270_v13 = vld [vmem:[#allocation2 + $0x20] sm:$0xff]  ;;  %v271_v14 = vld [vmem:[#allocation2 + $0x28] sm:$0xff]  ;;  %v272_v21 = vld [vmem:[#allocation2 + $0x30] sm:$0xff]  ;;  %v2471_v6 = vmov 1966171168   ;;  %vm2101_vm10 = vcmask 7168  }
  0x17   :  { %2216 = vmatmul.mubr.msk.f32.vlgmr.msra.gmra.mrb[0].mxu1 %vm57_vm0, %v51_v5  ;;  %v2334_v15 = vpack.c.bf16 %v271_v14, %v270_v13  ;;  %v2109_v16 = vld [vmem:[%s3004_s3] ss:$0 sm:$0xff]  ;;  %v273_v22 = vld [vmem:[#allocation2 + $0x38] sm:$0xff]  ;;  %v359_v32 = vld [vmem:[#allocation2 + $0x48] sm:$0xff]  ;;  %v637_v7 = vunpack.c.l.s4 %v2471_v6 }
  0x18   :  { %2327 = vmatprep.subr.bf16.mxu1 %v2326_v8  ;;  %v2338_v29 = vpack.c.bf16 %v273_v22, %v272_v21  ;;  %v358_v31 = vld [vmem:[#allocation2 + $0x40] sm:$0xff]  ;;  %v360_v37 = vld [vmem:[#allocation2 + $0x50] sm:$0xff]  ;;  %v361_v38 = vld [vmem:[#allocation2 + $0x58] sm:$0xff] }
  0x19   :  { %2329 = vmatpush3.bf16.msra.mxu1 %v2326_v8  ;;  %2213 = vmatmul.mubr.msk.f32.gmra.mrb[2].mxu0 %vm57_vm0, %v49_v9  ;;  %v2342_v36 = vpack.c.bf16 %v359_v32, %v358_v31  ;;  %v2346_v41 = vpack.c.bf16 %v361_v38, %v360_v37  ;;  %v460_v44 = vld [vmem:[#allocation2 + $0x60] sm:$0xff]  ;;  %v461_v45 = vld [vmem:[#allocation2 + $0x68] sm:$0xff]  ;;  %v462_v47 = vld [vmem:[#allocation2 + $0x70] sm:$0xff]  ;;  %v639_v8 = vlaneseq  ;;  %v638_v9 = vunpack.c.0.s8 %v637_v7 }
  0x1a   :  { %2331 = vmatprep.subr.bf16.mxu1 %v2330_v12  ;;  %v2350_v46 = vpack.c.bf16 %v461_v45, %v460_v44  ;;  %v463_v48 = vld [vmem:[#allocation2 + $0x78] sm:$0xff]  ;;  %v550_v50 = vld [vmem:[#allocation2 + $0x80] sm:$0xff]  ;;  %v551_v51 = vld [vmem:[#allocation2 + $0x88] sm:$0xff] }
  0x1b   :  { %v2354_v49 = vpack.c.bf16 %v463_v48, %v462_v47  ;;  %v2358_v52 = vpack.c.bf16 %v551_v51, %v550_v50  ;;  %v2118_v54 = vld [vmem:[%s3004_s3 + $0x1] ss:$0 sm:$0xff]  ;;  %v2123_v55 = vld [vmem:[%s3004_s3 + $0x2] ss:$0 sm:$0xff]  ;;  %v2124_v59 = vld [vmem:[%s3004_s3 + $0x3] ss:$0 sm:$0xff] }
  0x1c   :  { %2351 = vmatprep.subr.bf16.mxu0 %v2350_v46  ;;  %v552_v1 = vld [vmem:[#allocation2 + $0x90] sm:$0xff]  ;;  %v553_v2 = vld [vmem:[#allocation2 + $0x98] sm:$0xff]  ;;  %v2578_v10 = vshrl.u32 %v639_v8, 7  ;;  %v2125_v11 = vld [vmem:[%s3004_s3 + $0x4] ss:$0 sm:$0xff] }
  0x1d   :  { %2333 = vmatpush3.bf16.msra.mxu1 %v2330_v12  ;;  %2353 = vmatpush3.bf16.msra.mxu0 %v2350_v46  ;;  %v2362_v5 = vpack.c.bf16 %v553_v2, %v552_v1 }
  0x1e   :  { %2335 = vmatprep.subr.bf16.mxu1 %v2334_v15  ;;  %2355 = vmatprep.subr.bf16.mxu0 %v2354_v49  ;;  %v641_v12 = vsub.s32 %v638_v9, %v2578_v10  ;;  %v2585_v21 = vsub.s32 0, %v2578_v10 }
  0x21   :  { %2357 = vmatpush3.bf16.msra.mxu0 %v2354_v49  ;;  %v2604_v49 = vld [vmem:[%s3004_s3 + $0x7] ss:$0 sm:$0xff] }
  0x22   :  { %2359 = vmatprep.subr.bf16.mxu0 %v2358_v52 }
  0xe8   :  { %v2211_v17 = vpop.f32.mrb[0].mxu0 }
  0xe9   :  { %v148_v18 = vadd.f32 %v2211_v17, %v2109_v16  ;;  %v142_v19 = vpop.f32.mrb[1].mxu0 }
  0xea   :  { %v143_v20 = vadd.f32 %v2109_v16, %v142_v19  ;;  %v2217_v23 = vpop.f32.mrb[0].mxu1 }
  0xeb   :  { %v162_v24 = vpop.f32.mrb[1].mxu1  ;;  %v172_v27 = vmax.f32 %v148_v18, 0.0  ;;  %v168_v42 = vadd.f32 %v2217_v23, %v2109_v16 }
  0xec   :  { %v171_v25 = vmax.f32 %v143_v20, 0.0  ;;  %v2214_v26 = vpop.f32.mrb[2].mxu0  ;;  %v163_v34 = vadd.f32 %v2109_v16, %v162_v24 }
  0xed   :  { %v152_v28 = vpop.f32.mrb[3].mxu0  ;;  %v158_v35 = vadd.f32 %v2214_v26, %v2109_v16  ;;  %v176_v43 = vmax.f32 %v168_v42, 0.0 }
  0xee   :  { %2226 = vmatprep.mubr.msk.f32.mxu1 %vm181_vm1, %v171_v25  ;;  %v153_v30 = vadd.f32 %v2109_v16, %v152_v28  ;;  %v175_v39 = vmax.f32 %v163_v34, 0.0 }
  0xef   :  { %2227 = vmatmul.mubr.msk.f32.vlgmr.msra.gmra.mrb[2].mxu1 %vm181_vm1, %v172_v27  ;;  %v174_v40 = vmax.f32 %v158_v35, 0.0 }
  0xf0   :  { %v173_v33 = vmax.f32 %v153_v30, 0.0  ;;  %2337 = vmatpush3.bf16.msra.mxu1 %v2334_v15 }
  0xf1   :  { %2339 = vmatprep.subr.bf16.mxu1 %v2338_v29 }
  0xf2   :  { %2237 = vmatprep.mubr.msk.f32.mxu1 %vm181_vm1, %v173_v33 }
  0xf4   :  { %2341 = vmatpush3.bf16.msra.mxu1 %v2338_v29 }
  0xf5   :  { %2343 = vmatprep.subr.bf16.mxu1 %v2342_v36 }
  0xf7   :  { %2238 = vmatmul.mubr.msk.f32.vlgmr.msra.gmra.mrb[2].mxu1 %vm181_vm1, %v174_v40 }
  0xf8   :  { %2345 = vmatpush3.bf16.msra.mxu1 %v2342_v36  ;;  %2248 = vmatprep.mubr.msk.f32.mxu1 %vm181_vm1, %v175_v39 }
  0xf9   :  { %2347 = vmatprep.subr.bf16.mxu1 %v2346_v41 }
  0xfc   :  { %2349 = vmatpush3.bf16.msra.mxu1 %v2346_v41 }
  0xfd   :  { %2278 = vmatprep.subr.mxu1 %v2470_v53 }
  0xff   :  { %2249 = vmatmul.mubr.msk.f32.vlgmr.msra.gmra.mrb[2].mxu1 %vm181_vm1, %v176_v43 }
 0x100   :  { %2280 = vmatprep.mubr.msk.f32.mxu1 %vm2473_vm9, %v2470_v53 }
 0x1d2   :  { %v2250_v56 = vpop.f32.mrb[2].mxu1 }
 0x1d3   :  { %v2392_v57 = vadd.f32 %v2250_v56, %v2118_v54  ;;  %v434_v58 = vpop.f32.mrb[3].mxu1 }
 0x1d4   :  { %v2393_v60 = vadd.f32 %v2118_v54, %v434_v58 }
 0x1d5   :  { %v450_v61 = vmul.f32 %v2392_v57, %v2123_v55 }
 0x1d6   :  { %v449_v62 = vmul.f32 %v2393_v60, %v2123_v55 }
 0x1d7   :  { %v456_v63 = vadd.f32 %v2124_v59, %v450_v61 }
 0x1d8   :  { %v455_v0 = vadd.f32 %v2124_v59, %v449_v62 }
 0x1d9   :  { %v2567_v4 = vmax.f32 %v456_v63, 0.0 }
 0x1da   :  { %v457_v3 = vmax.f32 %v455_v0, 0.0 }
 0x1dc   :  { %2259 = vmatprep.mubr.msk.f32.mxu0 %vm181_vm1, %v457_v3 }
 0x1dd   :  { %2260 = vmatmul.mubr.msk.f32.vlgmr.msra.gmra.mrb[4].mxu0 %vm181_vm1, %v2567_v4 }
 0x1de   :  { %2361 = vmatpush3.bf16.msra.mxu0 %v2358_v52  ;;  %2270 = vmatprep.mubr.msk.f32.mxu0 %vm181_vm1, %v457_v3 }
 0x1df   :  { %2363 = vmatprep.subr.bf16.mxu0 %v2362_v5 }
 0x1e2   :  { %2365 = vmatpush3.bf16.msra.mxu0 %v2362_v5 }
 0x1e3   :  { %2273 = vmatprep.subr.mxu0 %v2470_v53 }
 0x1e5   :  { %2271 = vmatmul.mubr.msk.f32.vlgmr.msra.gmra.mrb[6].mxu0 %vm181_vm1, %v2567_v4 }
 0x1e6   :  { %2274 = vmatpush3.msra.mxu0 %v457_v3  ;;  %2275 = vmatprep.mubr.msk.f32.mxu0 %vm2473_vm9, %v2470_v53 }
 0x1e7   :  { %2283 = vmatprep.subr.mxu0 %v2470_v53 }
 0x2b0   :  { %v2261_v13 = vpop.f32.mrb[4].mxu0 }
 0x2b1   :  { %v546_v14 = vadd.f32 %v2261_v13, %v2125_v11  ;;  %v540_v15 = vpop.f32.mrb[5].mxu0 }
 0x2b2   :  { %v541_v16 = vadd.f32 %v2125_v11, %v540_v15 }
 0x2b3   :  { %v1239_v17 = vcombine.high %v546_v14, %v546_v14  ;;  %v1246_v18 = vrot.slane %v546_v14, %v641_v12 }
 0x2b4   :  { %v635_v19 = vcombine.high %v541_v16, %v541_v16  ;;  %v642_v20 = vrot.slane %v541_v16, %v641_v12 }
 0x2b5   :  { %v1253_v22 = vrot.slane %v1239_v17, %v641_v12  ;;  %v1254_v23 = vcombine.high %v1246_v18, %v1246_v18  ;;  %v1262_v24 = vrot.slane %v1246_v18, %v641_v12 }
 0x2b6   :  { %v649_v25 = vrot.slane %v635_v19, %v641_v12  ;;  %v650_v26 = vcombine.high %v642_v20, %v642_v20  ;;  %v658_v27 = vrot.slane %v642_v20, %v641_v12 }
 0x2b7   :  { %v1269_v28 = vrot.slane %v1253_v22, %v641_v12  ;;  %v1276_v29 = vrot.slane %v1254_v23, %v641_v12  ;;  %v1284_v30 = vcombine.high %v1262_v24, %v1262_v24  ;;  %v1255_v37 = vcombine.high %v1253_v22, %v1253_v22 }
 0x2b8   :  { %v672_v31 = vrot.slane %v650_v26, %v641_v12  ;;  %v680_v32 = vcombine.high %v658_v27, %v658_v27  ;;  %v2587_v33 = vpop.f32.mrb[6].mxu0  ;;  %v687_v35 = vrot.slane %v658_v27, %v2585_v21  ;;  %v651_v38 = vcombine.high %v649_v25, %v649_v25 }
 0x2b9   :  { %v1286_v34 = vcombine.high %v1276_v29, %v1276_v29  ;;  %v2590_v36 = vpop.f32.mrb[7].mxu0  ;;  %v665_v39 = vrot.slane %v649_v25, %v641_v12  ;;  %v1291_v40 = vrot.slane %v1262_v24, %v2585_v21  ;;  %v1295_v41 = vrot.slane %v1276_v29, %v2585_v21 }
 0x2ba   :  { %v724_v42 = vadd.f32 %v687_v35, %v2590_v36  ;;  %v1299_v43 = vrot.slane %v1284_v30, %v2585_v21  ;;  %v1307_v44 = vrot.slane %v1269_v28, %v2585_v21  ;;  %v695_v46 = vrot.slane %v680_v32, %v2585_v21 }
 0x2bb   :  { %v1328_v45 = vadd.f32 %v2587_v33, %v1291_v40  ;;  %v691_v47 = vrot.slane %v672_v31, %v2585_v21  ;;  %v1303_v48 = vrot.slane %v1286_v34, %v2585_v21  ;;  %v1329_v50 = vadd.f32 %v2587_v33, %v1295_v41 }
 0x2bc   :  { %v732_v51 = vmax.f32 %v724_v42, 0.0  ;;  %v1330_v52 = vadd.f32 %v2587_v33, %v1299_v43  ;;  %v1332_v54 = vadd.f32 %v2587_v33, %v1307_v44  ;;  %v726_v56 = vadd.f32 %v695_v46, %v2590_v36 }
 0x2bd   :  { %v1336_v55 = vmax.f32 %v1328_v45, 0.0  ;;  %v725_v57 = vadd.f32 %v691_v47, %v2590_v36  ;;  %v1331_v58 = vadd.f32 %v2587_v33, %v1303_v48  ;;  %v682_v59 = vcombine.high %v672_v31, %v672_v31 }
 0x2be   :  { %v1337_v60 = vmax.f32 %v1329_v50, 0.0  ;;  %v1338_v61 = vmax.f32 %v1330_v52, 0.0  ;;  %v740_v63 = vmul.f32 %v2604_v49, %v732_v51  ;;  %v1340_v0 = vmax.f32 %v1332_v54, 0.0 }
 0x2bf   :  { %v1344_v62 = vmul.f32 %v2604_v49, %v1336_v55  ;;  %v734_v1 = vmax.f32 %v726_v56, 0.0  ;;  %v679_v2 = vrot.slane %v651_v38, %v641_v12  ;;  %v681_v3 = vcombine.high %v665_v39, %v665_v39 }
 0x2c0   :  { %v1345_v5 = vmul.f32 %v2604_v49, %v1337_v60  ;;  %v1283_v6 = vrot.slane %v1255_v37, %v641_v12  ;;  %v1285_v7 = vcombine.high %v1269_v28, %v1269_v28  ;;  %v733_v11 = vmax.f32 %v725_v57, 0.0 }
 0x2c1   :  { %v1352_v9 = vsel %vm181_vm1, %v1344_v62, 0.0  ;;  %v1346_v14 = vmul.f32 %v2604_v49, %v1338_v61  ;;  %v1339_v15 = vmax.f32 %v1331_v58, 0.0  ;;  %v703_v16 = vrot.slane %v665_v39, %v2585_v21 }
 0x2c2   :  { %1353 = vadd.xlane.f32.xlu0 %v1352_v9  ;;  %v1355_v13 = vsel %vm181_vm1, %v1345_v5, 0.0  ;;  %v748_v17 = vsel %vm181_vm1, %v740_v63, 0.0  ;;  %v1348_v18 = vmul.f32 %v2604_v49, %v1340_v0  ;;  %v742_v19 = vmul.f32 %v2604_v49, %v734_v1 }
 0x2c3   :  { %1356 = vadd.xlane.f32.xlu1 %v1355_v13  ;;  %v699_v12 = vrot.slane %v682_v59, %v2585_v21  ;;  %v728_v20 = vadd.f32 %v703_v16, %v2590_v36  ;;  %v711_v22 = vrot.slane %v681_v3, %v2585_v21  ;;  %v707_v23 = vrot.slane %v679_v2, %v2585_v21 }
 0x2c4   :  { %v683_v24 = vcombine.high %v679_v2, %v679_v2  ;;  %v1311_v26 = vrot.slane %v1283_v6, %v2585_v21  ;;  %v1315_v27 = vrot.slane %v1285_v7, %v2585_v21  ;;  %v1287_v28 = vcombine.high %v1283_v6, %v1283_v6 }
 0x2c5   :  { %v727_v25 = vadd.f32 %v699_v12, %v2590_v36  ;;  %v1358_v29 = vsel %vm181_vm1, %v1346_v14, 0.0  ;;  %v730_v30 = vadd.f32 %v711_v22, %v2590_v36  ;;  %v729_v31 = vadd.f32 %v707_v23, %v2590_v36 }
 0x2c6   :  { %749 = vadd.xlane.f32.xlu0 %v748_v17  ;;  %v715_v32 = vrot.slane %v683_v24, %v2585_v21  ;;  %v1333_v34 = vadd.f32 %v2587_v33, %v1311_v26  ;;  %v1334_v35 = vadd.f32 %v2587_v33, %v1315_v27  ;;  %v1319_v37 = vrot.slane %v1287_v28, %v2585_v21 }
 0x2c7   :  { %1359 = vadd.xlane.f32.xlu1 %v1358_v29  ;;  %v1364_v39 = vsel %vm181_vm1, %v1348_v18, 0.0  ;;  %v741_v40 = vmul.f32 %v2604_v49, %v733_v11  ;;  %v736_v41 = vmax.f32 %v728_v20, 0.0  ;;  %v754_v43 = vsel %vm181_vm1, %v742_v19, 0.0 }
 0x2c8   :  { %v731_v38 = vadd.f32 %v715_v32, %v2590_v36  ;;  %v1335_v42 = vadd.f32 %v2587_v33, %v1319_v37  ;;  %v1347_v44 = vmul.f32 %v2604_v49, %v1339_v15  ;;  %v735_v45 = vmax.f32 %v727_v25, 0.0 }
 0x2c9   :  { %v751_v46 = vsel %vm181_vm1, %v741_v40, 0.0  ;;  %v744_v47 = vmul.f32 %v2604_v49, %v736_v41  ;;  %v738_v48 = vmax.f32 %v730_v30, 0.0  ;;  %v737_v51 = vmax.f32 %v729_v31, 0.0 }
 0x2ca   :  { %1365 = vadd.xlane.f32.xlu0 %v1364_v39  ;;  %v1361_v36 = vsel %vm181_vm1, %v1347_v44, 0.0  ;;  %v743_v50 = vmul.f32 %v2604_v49, %v735_v45  ;;  %v739_v54 = vmax.f32 %v731_v38, 0.0  ;;  %v1341_v57 = vmax.f32 %v1333_v34, 0.0 }
 0x2cb   :  { %755 = vadd.xlane.f32.xlu1 %v754_v43  ;;  %v760_v33 = vsel %vm181_vm1, %v744_v47, 0.0  ;;  %v746_v52 = vmul.f32 %v2604_v49, %v738_v48  ;;  %v745_v56 = vmul.f32 %v2604_v49, %v737_v51  ;;  %v1342_v60 = vmax.f32 %v1334_v35, 0.0 }
 0x2cc   :  { %v757_v55 = vsel %vm181_vm1, %v743_v50, 0.0  ;;  %v747_v59 = vmul.f32 %v2604_v49, %v739_v54  ;;  %v1349_v62 = vmul.f32 %v2604_v49, %v1341_v57  ;;  %v1343_v63 = vmax.f32 %v1335_v42, 0.0 }
 0x2cd   :  { %v766_v58 = vsel %vm181_vm1, %v746_v52, 0.0  ;;  %v763_v61 = vsel %vm181_vm1, %v745_v56, 0.0  ;;  %v1350_v1 = vmul.f32 %v2604_v49, %v1342_v60  ;;  %v781_v14 = vand.u32 127, %v639_v8 }
 0x2ce   :  { %752 = vadd.xlane.f32.xlu0 %v751_v46  ;;  %v769_v0 = vsel %vm181_vm1, %v747_v59, 0.0  ;;  %v1367_v2 = vsel %vm181_vm1, %v1349_v62, 0.0  ;;  %v1351_v3 = vmul.f32 %v2604_v49, %v1343_v63  ;;  %v2472_v60 = vmov 0  }
 0x2cf   :  { %1362 = vadd.xlane.f32.xlu1 %v1361_v36  ;;  %v1370_v5 = vsel %vm181_vm1, %v1350_v1, 0.0  ;;  %v2674_v16 = vsub.s32 %v781_v14, %v2578_v10  ;;  %2406 = vset.pattern.permute.xlu0 %v2472_v60  ;;  %v2744_v63 = vsub.s32 2, %v2578_v10 }
 0x2d0   :  { %v1373_v6 = vsel %vm181_vm1, %v1351_v3, 0.0  ;;  %2405 = vset.pattern.permute.xlu1 %v2472_v60 }
 0x2d2   :  { %761 = vadd.xlane.f32.xlu0 %v760_v33 }
 0x2d3   :  { %758 = vadd.xlane.f32.xlu1 %v757_v55 }
 0x2d6   :  { %767 = vadd.xlane.f32.xlu0 %v766_v58 }
 0x2d7   :  { %764 = vadd.xlane.f32.xlu1 %v763_v61  ;;  %v2739_v61 = vsub.s32 1, %v2578_v10 }
 0x2da   :  { %770 = vadd.xlane.f32.xlu0 %v769_v0 }
 0x2db   :  { %1368 = vadd.xlane.f32.xlu1 %v1367_v2 }
 0x2de   :  { %1371 = vadd.xlane.f32.xlu0 %v1370_v5  ;;  %v2755_v5 = vsub.s32 4, %v2578_v10 }
 0x2df   :  { %1374 = vadd.xlane.f32.xlu1 %v1373_v6 }
 0x34f   :  { %v2660_v7 = vpop.xlane.xlu0 %1353 }
 0x350   :  { %v2662_v9 = vpop.xlane.xlu1 %1356  ;;  %v1387_v28 = vrot.slane %v2660_v7, %v2674_v16 }
 0x351   :  { %v1391_v24 = vrot.slane %v2662_v9, %v2674_v16 }
 0x353   :  { %v2664_v11 = vpop.xlane.xlu0 %749  ;;  %v1416_v35 = vsel %vm814_vm2, %v1391_v24, %v1387_v28  ;;  %v2771_v28 = vsub.s32 5, %v2578_v10 }
 0x354   :  { %v2666_v13 = vpop.xlane.xlu1 %1359  ;;  %v785_v12 = vrot.slane %v2664_v11, %v2674_v16 }
 0x355   :  { %v1395_v26 = vrot.slane %v2666_v13, %v2674_v16 }
 0x357   :  { %v2669_v15 = vpop.xlane.xlu0 %1365  ;;  %v1417_v38 = vsel %vm816_vm3, %v1395_v26, %v1416_v35 }
 0x358   :  { %v2671_v49 = vpop.xlane.xlu1 %755  ;;  %v1403_v44 = vrot.slane %v2669_v15, %v2674_v16 }
 0x359   :  { %v793_v22 = vrot.slane %v2671_v49, %v2674_v16 }
 0x35b   :  { %v2676_v17 = vpop.xlane.xlu0 %752 }
 0x35c   :  { %v789_v18 = vrot.slane %v2676_v17, %v2674_v16  ;;  %v2680_v19 = vpop.xlane.xlu1 %1362 }
 0x35d   :  { %v1399_v29 = vrot.slane %v2680_v19, %v2674_v16 }
 0x35e   :  { %v815_v8 = vsel %vm814_vm2, %v789_v18, %v785_v12  ;;  %v2762_v12 = vsub.s32 3, %v2578_v10 }
 0x35f   :  { %v2685_v20 = vpop.xlane.xlu0 %761  ;;  %v817_v27 = vsel %vm816_vm3, %v793_v22, %v815_v8  ;;  %v1418_v41 = vsel %vm818_vm4, %v1399_v29, %v1417_v38 }
 0x360   :  { %v2689_v23 = vpop.xlane.xlu1 %758  ;;  %v801_v32 = vrot.slane %v2685_v20, %v2674_v16  ;;  %v1419_v50 = vsel %vm820_vm6, %v1403_v44, %v1418_v41 }
 0x361   :  { %v797_v25 = vrot.slane %v2689_v23, %v2674_v16 }
 0x363   :  { %v819_v30 = vsel %vm818_vm4, %v797_v25, %v817_v27  ;;  %v2703_v31 = vpop.xlane.xlu0 %767 }
 0x364   :  { %v2707_v34 = vpop.xlane.xlu1 %764  ;;  %v809_v39 = vrot.slane %v2703_v31, %v2674_v16  ;;  %v821_v40 = vsel %vm820_vm6, %v801_v32, %v819_v30  ;;  %v2780_v32 = vsub.s32 7, %v2578_v10 }
 0x365   :  { %v805_v37 = vrot.slane %v2707_v34, %v2674_v16 }
 0x367   :  { %v2717_v42 = vpop.xlane.xlu0 %770  ;;  %v823_v43 = vsel %vm822_vm5, %v805_v37, %v821_v40 }
 0x368   :  { %v813_v45 = vrot.slane %v2717_v42, %v2674_v16  ;;  %v1369_v46 = vpop.xlane.xlu1 %1368  ;;  %v825_v47 = vsel %vm824_vm7, %v809_v39, %v823_v43 }
 0x369   :  { %v1407_v48 = vrot.slane %v1369_v46, %v2674_v16 }
 0x36a   :  { %v827_v36 = vsel %vm826_vm8, %v813_v45, %v825_v47 }
 0x36b   :  { %v2728_v51 = vpop.xlane.xlu0 %1371  ;;  %v829_v33 = vsel %vm57_vm0, %v827_v36, -inf  ;;  %v1420_v52 = vsel %vm822_vm5, %v1407_v48, %v1419_v50 }
 0x36c   :  { %v1411_v54 = vrot.slane %v2728_v51, %v2674_v16  ;;  %830 = vmax.xlane.f32.xlu0 %v829_v33  ;;  %v1375_v55 = vpop.xlane.xlu1 %1374  ;;  %v2802_v33 = vsub.s32 6, %v2578_v10 }
 0x36d   :  { %v1415_v56 = vrot.slane %v1375_v55, %v2674_v16 }
 0x36e   :  { %v1421_v57 = vsel %vm824_vm7, %v1411_v54, %v1420_v52 }
 0x36f   :  { %v1422_v58 = vsel %vm826_vm8, %v1415_v56, %v1421_v57 }
 0x370   :  { %v1424_v59 = vsel %vm57_vm0, %v1422_v58, -inf }
 0x371   :  { %1425 = vmax.xlane.f32.xlu1 %v1424_v59 }
 0x3f9   :  { %v2746_v0 = vpop.xlane.xlu0 %830 }
 0x3fa   :  { %v836_v6 = vrot.slane %v2746_v0, %v2585_v21  ;;  %v844_v35 = vrot.slane %v2746_v0, %v2744_v63  ;;  %v856_v54 = vrot.slane %v2746_v0, %v2771_v28  ;;  %v860_v57 = vrot.slane %v2746_v0, %v2802_v33 }
 0x3fc   :  { %v873_v25 = vsub.f32 %v2664_v11, %v836_v6  ;;  %v875_v41 = vsub.f32 %v2671_v49, %v844_v35  ;;  %v878_v58 = vsub.f32 %v2707_v34, %v856_v54 }
 0x3fe   :  { %v2741_v62 = vpop.xlane.xlu1 %1425  ;;  %v881_v30 = vmul.f32 1.442695, %v873_v25  ;;  %v885_v36 = vmul.f32 1.442695, %v875_v41 }
 0x3ff   :  { %v1431_v1 = vrot.slane %v2741_v62, %v2585_v21  ;;  %v1435_v2 = vrot.slane %v2741_v62, %v2739_v61  ;;  %v1439_v3 = vrot.slane %v2741_v62, %v2744_v63  ;;  %v1447_v8 = vrot.slane %v2741_v62, %v2755_v5 }
 0x400   :  { %v1443_v26 = vrot.slane %v2741_v62, %v2762_v12 }
 0x401   :  { %v1468_v14 = vsub.f32 %v2660_v7, %v1431_v1  ;;  %v1470_v18 = vsub.f32 %v2666_v13, %v1439_v3  ;;  %v1469_v22 = vsub.f32 %v2662_v9, %v1435_v2  ;;  %v840_v7 = vrot.slane %v2746_v0, %v2739_v61 }
 0x402   :  { %v1472_v13 = vsub.f32 %v2669_v15, %v1447_v8  ;;  %v1451_v9 = vrot.slane %v2741_v62, %v2771_v28  ;;  %v1471_v11 = vsub.f32 %v2680_v19, %v1443_v26  ;;  %v1459_v15 = vrot.slane %v2741_v62, %v2780_v32 }
 0x403   :  { %v1476_v24 = vmul.f32 1.442695, %v1468_v14  ;;  %v1480_v27 = vmul.f32 1.442695, %v1470_v18  ;;  %v1478_v29 = vmul.f32 1.442695, %v1469_v22  ;;  %v874_v37 = vsub.f32 %v2676_v17, %v840_v7 }
 0x404   :  { %v1484_v38 = vmul.f32 1.442695, %v1472_v13  ;;  %v1473_v39 = vsub.f32 %v1369_v46, %v1451_v9  ;;  %v1482_v40 = vmul.f32 1.442695, %v1471_v11  ;;  %v848_v19 = vrot.slane %v2746_v0, %v2762_v12 }
 0x405   :  { %2407 = vpow2.f32 %v1476_v24  ;;  %v883_v43 = vmul.f32 1.442695, %v874_v37  ;;  %v1475_v45 = vsub.f32 %v1375_v55, %v1459_v15  ;;  %v852_v46 = vrot.slane %v2746_v0, %v2755_v5 }
 0x406   :  { %2409 = vpow2.f32 %v1480_v27  ;;  %v1486_v17 = vmul.f32 1.442695, %v1473_v39  ;;  %v876_v48 = vsub.f32 %v2689_v23, %v848_v19  ;;  %v864_v1 = vrot.slane %v2746_v0, %v2780_v32 }
 0x407   :  { %2411 = vpow2.f32 %v1478_v29  ;;  %v1490_v50 = vmul.f32 1.442695, %v1475_v45  ;;  %v877_v23 = vsub.f32 %v2685_v20, %v852_v46  ;;  %v879_v2 = vsub.f32 %v2703_v31, %v860_v57 }
 0x408   :  { %2413 = vpow2.f32 %v881_v30  ;;  %v887_v55 = vmul.f32 1.442695, %v876_v48  ;;  %v891_v3 = vmul.f32 1.442695, %v878_v58  ;;  %v880_v14 = vsub.f32 %v2717_v42, %v864_v1 }
 0x409   :  { %2415 = vpow2.f32 %v1484_v38  ;;  %v889_v59 = vmul.f32 1.442695, %v877_v23  ;;  %v893_v18 = vmul.f32 1.442695, %v879_v2  ;;  %v1455_v8 = vrot.slane %v2741_v62, %v2802_v33 }
 0x40a   :  { %2417 = vpow2.f32 %v1482_v40  ;;  %v895_v0 = vmul.f32 1.442695, %v880_v14 }
 0x40b   :  { %2419 = vpow2.f32 %v883_v43  ;;  %v1474_v22 = vsub.f32 %v2728_v51, %v1455_v8 }
 0x40c   :  { %2421 = vpow2.f32 %v1486_v17 }
 0x40d   :  { %2423 = vpow2.f32 %v885_v36  ;;  %v1488_v42 = vmul.f32 1.442695, %v1474_v22 }
 0x40e   :  { %2425 = vpow2.f32 %v1490_v50 }
 0x40f   :  { %v2790_v44 = vpop.eup %2407  ;;  %2427 = vpow2.f32 %v887_v55 }
 0x410   :  { %1501 = vperm.xlu1 %2405, %v2790_v44   ;;  %v2793_v47 = vpop.eup %2409  ;;  %2429 = vpow2.f32 %v889_v59 }
 0x411   :  { %1507 = vperm.xlu0 %2406, %v2793_v47   ;;  %v2799_v49 = vpop.eup %2411  ;;  %2431 = vpow2.f32 %v891_v3 }
 0x412   :  { %v2805_v52 = vpop.eup %2413  ;;  %2433 = vpow2.f32 %v893_v18 }
 0x413   :  { %v2811_v56 = vpop.eup %2415  ;;  %2435 = vpow2.f32 %v895_v0 }
 0x414   :  { %1504 = vperm.xlu1 %2405, %v2799_v49   ;;  %v2814_v10 = vpop.eup %2417  ;;  %2437 = vpow2.f32 %v1488_v42 }
 0x415   :  { %906 = vperm.xlu0 %2406, %v2805_v52   ;;  %v2820_v20 = vpop.eup %2419 }
 0x416   :  { %v2823_v60 = vpop.eup %2421 }
 0x417   :  { %v2829_v34 = vpop.eup %2423 }
 0x418   :  { %1513 = vperm.xlu1 %2405, %v2811_v56   ;;  %v2832_v6 = vpop.eup %2425 }
 0x419   :  { %1510 = vperm.xlu0 %2406, %v2814_v10   ;;  %v2838_v31 = vpop.eup %2427 }
 0x41a   :  { %v2842_v24 = vpop.eup %2429 }
 0x41b   :  { %v2845_v25 = vpop.eup %2431 }
 0x41c   :  { %909 = vperm.xlu1 %2405, %v2820_v20   ;;  %v2848_v62 = vpop.eup %2433 }
 0x41d   :  { %1516 = vperm.xlu0 %2406, %v2823_v60   ;;  %v2851_v26 = vpop.eup %2435 }
 0x41e   :  { %v2854_v51 = vpop.eup %2437 }
 0x420   :  { %912 = vperm.xlu1 %2405, %v2829_v34  }
 0x421   :  { %1522 = vperm.xlu0 %2406, %v2832_v6  }
 0x424   :  { %915 = vperm.xlu1 %2405, %v2838_v31  }
 0x428   :  { %918 = vperm.xlu1 %2405, %v2842_v24  }
 0x42c   :  { %921 = vperm.xlu1 %2405, %v2845_v25  }
 0x430   :  { %924 = vperm.xlu1 %2405, %v2848_v62  }
 0x434   :  { %927 = vperm.xlu1 %2405, %v2851_v26  }
 0x438   :  { %1519 = vperm.xlu1 %2405, %v2854_v51  }
 0x48f   :  { %v1502_v27 = vpop.permute.xlu1 %1501 }
 0x490   :  { %v1508_v30 = vpop.permute.xlu0 %1507  ;;  %v1527_v45 = vrot.slane %v1502_v27, %v2674_v16 }
 0x491   :  { %v1535_v58 = vrot.slane %v1508_v30, %v2674_v16 }
 0x493   :  { %v1505_v7 = vpop.permute.xlu1 %1504 }
 0x494   :  { %v907_v35 = vpop.permute.xlu0 %906  ;;  %v1531_v40 = vrot.slane %v1505_v7, %v2674_v16 }
 0x495   :  { %v932_v41 = vrot.slane %v907_v35, %v2674_v16 }
 0x496   :  { %v1556_v54 = vsel %vm814_vm2, %v1531_v40, %v1527_v45 }
 0x497   :  { %v1514_v13 = vpop.permute.xlu1 %1513  ;;  %v1557_v14 = vsel %vm816_vm3, %v1535_v58, %v1556_v54 }
 0x498   :  { %v1511_v38 = vpop.permute.xlu0 %1510  ;;  %v1543_v3 = vrot.slane %v1514_v13, %v2674_v16 }
 0x499   :  { %v1539_v23 = vrot.slane %v1511_v38, %v2674_v16 }
 0x49b   :  { %v910_v29 = vpop.permute.xlu1 %909  ;;  %v1558_v0 = vsel %vm818_vm4, %v1539_v23, %v1557_v14 }
 0x49c   :  { %v936_v39 = vrot.slane %v910_v29, %v2674_v16  ;;  %v1517_v36 = vpop.permute.xlu0 %1516  ;;  %v1559_v13 = vsel %vm820_vm6, %v1543_v3, %v1558_v0 }
 0x49d   :  { %v1547_v22 = vrot.slane %v1517_v36, %v2674_v16 }
 0x49e   :  { %v961_v48 = vsel %vm814_vm2, %v936_v39, %v932_v41 }
 0x49f   :  { %v913_v9 = vpop.permute.xlu1 %912 }
 0x4a0   :  { %v940_v19 = vrot.slane %v913_v9, %v2674_v16  ;;  %v1523_v27 = vpop.permute.xlu0 %1522 }
 0x4a1   :  { %v1555_v35 = vrot.slane %v1523_v27, %v2674_v16 }
 0x4a2   :  { %v962_v55 = vsel %vm816_vm3, %v940_v19, %v961_v48 }
 0x4a3   :  { %v916_v11 = vpop.permute.xlu1 %915 }
 0x4a4   :  { %v944_v43 = vrot.slane %v916_v11, %v2674_v16  ;;  %v1560_v11 = vsel %vm822_vm5, %v1547_v22, %v1559_v13 }
 0x4a6   :  { %v963_v59 = vsel %vm818_vm4, %v944_v43, %v962_v55 }
 0x4a7   :  { %v919_v37 = vpop.permute.xlu1 %918 }
 0x4a8   :  { %v948_v17 = vrot.slane %v919_v37, %v2674_v16 }
 0x4aa   :  { %v964_v1 = vsel %vm820_vm6, %v948_v17, %v963_v59 }
 0x4ab   :  { %v922_v15 = vpop.permute.xlu1 %921 }
 0x4ac   :  { %v952_v50 = vrot.slane %v922_v15, %v2674_v16 }
 0x4ae   :  { %v965_v18 = vsel %vm822_vm5, %v952_v50, %v964_v1 }
 0x4af   :  { %v925_v46 = vpop.permute.xlu1 %924 }
 0x4b0   :  { %v956_v57 = vrot.slane %v925_v46, %v2674_v16 }
 0x4b2   :  { %v966_v42 = vsel %vm824_vm7, %v956_v57, %v965_v18 }
 0x4b3   :  { %v928_v2 = vpop.permute.xlu1 %927 }
 0x4b4   :  { %v960_v8 = vrot.slane %v928_v2, %v2674_v16 }
 0x4b6   :  { %v967_v7 = vsel %vm826_vm8, %v960_v8, %v966_v42 }
 0x4b7   :  { %v1520_v29 = vpop.permute.xlu1 %1519  ;;  %v969_v30 = vsel %vm57_vm0, %v967_v7, 0.0 }
 0x4b8   :  { %v1551_v9 = vrot.slane %v1520_v29, %v2674_v16  ;;  %970 = vadd.xlane.f32.xlu1 %v969_v30 }
 0x4ba   :  { %v1561_v37 = vsel %vm824_vm7, %v1551_v9, %v1560_v11 }
 0x4bb   :  { %v1562_v38 = vsel %vm826_vm8, %v1555_v35, %v1561_v37 }
 0x4bc   :  { %v1564_v15 = vsel %vm57_vm0, %v1562_v38, 0.0 }
 0x4bd   :  { %1565 = vadd.xlane.f32.xlu0 %v1564_v15 }
 0x545   :  { %v971_v40 = vpop.xlane.xlu1 %970 }
 0x54a   :  { %v1566_v39 = vpop.xlane.xlu0 %1565 }
 0x54b   :  { %2439 = vrcp.f32 %v1566_v39 }
 0x54c   :  { %2441 = vrcp.f32 %v971_v40 }
 0x555   :  { %v2440_v19 = vpop.eup %2439 }
 0x556   :  { %v1576_v41 = vrot.slane %v2440_v19, %v2739_v61  ;;  %v1572_v43 = vrot.slane %v2440_v19, %v2585_v21  ;;  %v1580_v46 = vrot.slane %v2440_v19, %v2744_v63  ;;  %v1588_v48 = vrot.slane %v2440_v19, %v2755_v5  ;;  %v2442_v36 = vpop.eup %2441 }
 0x557   :  { %v1584_v23 = vrot.slane %v2440_v19, %v2762_v12  ;;  %v981_v55 = vrot.slane %v2442_v36, %v2739_v61  ;;  %v977_v57 = vrot.slane %v2442_v36, %v2585_v21  ;;  %v985_v58 = vrot.slane %v2442_v36, %v2744_v63 }
 0x558   :  { %v1610_v45 = vmul.f32 %v2799_v49, %v1576_v41  ;;  %v1609_v17 = vmul.f32 %v2790_v44, %v1572_v43  ;;  %v1611_v50 = vmul.f32 %v2793_v47, %v1580_v46  ;;  %v1613_v54 = vmul.f32 %v2811_v56, %v1588_v48 }
 0x559   :  { %v1612_v49 = vmul.f32 %v2814_v10, %v1584_v23  ;;  %v1015_v44 = vmul.f32 %v2820_v20, %v981_v55  ;;  %v1014_v47 = vmul.f32 %v2805_v52, %v977_v57  ;;  %v1016_v56 = vmul.f32 %v2829_v34, %v985_v58 }
 0x55a   :  { %1629 = vperm.xlu0 %2406, %v1610_v45   ;;  %1626 = vperm.xlu1 %2405, %v1609_v17   ;;  %v989_v59 = vrot.slane %v2442_v36, %v2762_v12  ;;  %v993_v61 = vrot.slane %v2442_v36, %v2755_v5  ;;  %v997_v21 = vrot.slane %v2442_v36, %v2771_v28 }
 0x55b   :  { %v1001_v63 = vrot.slane %v2442_v36, %v2802_v33  ;;  %v1592_v12 = vrot.slane %v2440_v19, %v2771_v28  ;;  %v1005_v5 = vrot.slane %v2442_v36, %v2780_v32  ;;  %v1600_v1 = vrot.slane %v2440_v19, %v2780_v32 }
 0x55c   :  { %v1017_v10 = vmul.f32 %v2838_v31, %v989_v59  ;;  %v1018_v20 = vmul.f32 %v2842_v24, %v993_v61  ;;  %v1019_v52 = vmul.f32 %v2845_v25, %v997_v21  ;;  %v1596_v2 = vrot.slane %v2440_v19, %v2802_v33  ;;  %v1831_v61 = vld [vmem:[#allocation2 + $0xa0] sm:$0xff] }
 0x55d   :  { %v1020_v34 = vmul.f32 %v2848_v62, %v1001_v63  ;;  %v1614_v31 = vmul.f32 %v2823_v60, %v1592_v12  ;;  %v1021_v24 = vmul.f32 %v2851_v26, %v1005_v5  ;;  %v1616_v25 = vmul.f32 %v2832_v6, %v1600_v1  ;;  %v1834_v63 = vld [vmem:[#allocation2 + $0xb8] sm:$0xff] }
 0x55e   :  { %1632 = vperm.xlu0 %2406, %v1611_v50   ;;  %1638 = vperm.xlu1 %2405, %v1613_v54   ;;  %v1615_v62 = vmul.f32 %v2854_v51, %v1596_v2 }
 0x562   :  { %1635 = vperm.xlu0 %2406, %v1612_v49   ;;  %1034 = vperm.xlu1 %2405, %v1015_v44  }
 0x566   :  { %1031 = vperm.xlu0 %2406, %v1014_v47   ;;  %1037 = vperm.xlu1 %2405, %v1016_v56  }
 0x56a   :  { %1040 = vperm.xlu0 %2406, %v1017_v10   ;;  %1043 = vperm.xlu1 %2405, %v1018_v20   ;;  %v1832_v10 = vld [vmem:[#allocation2 + $0xa8] sm:$0xff]  ;;  %v1833_v20 = vld [vmem:[#allocation2 + $0xb0] sm:$0xff] }
 0x56b   :  { %v2366_v21 = vpack.c.bf16 %v1832_v10, %v1831_v61 }
 0x56e   :  { %1046 = vperm.xlu0 %2406, %v1019_v52   ;;  %1049 = vperm.xlu1 %2405, %v1020_v34   ;;  %v2370_v52 = vpack.c.bf16 %v1834_v63, %v1833_v20 }
 0x572   :  { %1641 = vperm.xlu0 %2406, %v1614_v31   ;;  %1052 = vperm.xlu1 %2405, %v1021_v24   ;;  %v1921_v31 = vld [vmem:[#allocation2 + $0xc0] sm:$0xff]  ;;  %v1922_v24 = vld [vmem:[#allocation2 + $0xc8] sm:$0xff] }
 0x573   :  { %v2374_v1 = vpack.c.bf16 %v1922_v24, %v1921_v31 }
 0x576   :  { %1647 = vperm.xlu0 %2406, %v1616_v25   ;;  %1644 = vperm.xlu1 %2405, %v1615_v62  }
 0x5d9   :  { %v1630_v28 = vpop.permute.xlu0 %1629  ;;  %v1627_v60 = vpop.permute.xlu1 %1626 }
 0x5da   :  { %v1656_v13 = vrot.slane %v1630_v28, %v2674_v16  ;;  %v1652_v9 = vrot.slane %v1627_v60, %v2674_v16  ;;  %v1923_v60 = vld [vmem:[#allocation2 + $0xd0] sm:$0xff] }
 0x5dc   :  { %v1681_v41 = vsel %vm814_vm2, %v1656_v13, %v1652_v9 }
 0x5dd   :  { %v1633_v32 = vpop.permute.xlu0 %1632  ;;  %v1639_v26 = vpop.permute.xlu1 %1638 }
 0x5de   :  { %v1660_v37 = vrot.slane %v1633_v32, %v2674_v16  ;;  %v1668_v54 = vrot.slane %v1639_v26, %v2674_v16  ;;  %v2012_v26 = vld [vmem:[%s3005_s4] sm:$0xff] }
 0x5e0   :  { %v1682_v17 = vsel %vm816_vm3, %v1660_v37, %v1681_v41 }
 0x5e1   :  { %v1636_v33 = vpop.permute.xlu0 %1635  ;;  %v1035_v3 = vpop.permute.xlu1 %1034 }
 0x5e2   :  { %v1061_v6 = vrot.slane %v1035_v3, %v2674_v16  ;;  %v1664_v15 = vrot.slane %v1636_v33, %v2674_v16  ;;  %v2013_v33 = vld [vmem:[%s3005_s4 + $0x8] sm:$0xff] }
 0x5e3   :  { %v2382_v3 = vpack.c.bf16 %v2013_v33, %v2012_v26 }
 0x5e4   :  { %v1683_v48 = vsel %vm818_vm4, %v1664_v15, %v1682_v17 }
 0x5e5   :  { %v1032_v14 = vpop.permute.xlu0 %1031  ;;  %v1038_v18 = vpop.permute.xlu1 %1037  ;;  %v1684_v44 = vsel %vm820_vm6, %v1668_v54, %v1683_v48 }
 0x5e6   :  { %v1057_v51 = vrot.slane %v1032_v14, %v2674_v16  ;;  %v1065_v8 = vrot.slane %v1038_v18, %v2674_v16  ;;  %v2135_v14 = vld [vmem:[%s3004_s3 + $0x5] ss:$0 sm:$0xff] }
 0x5e8   :  { %v1086_v0 = vsel %vm814_vm2, %v1061_v6, %v1057_v51 }
 0x5e9   :  { %v1041_v22 = vpop.permute.xlu0 %1040  ;;  %v1044_v42 = vpop.permute.xlu1 %1043  ;;  %v1087_v7 = vsel %vm816_vm3, %v1065_v8, %v1086_v0  ;;  %v2014_v0 = vld [vmem:[%s3005_s4 + $0x10] sm:$0xff] }
 0x5ea   :  { %v1069_v27 = vrot.slane %v1041_v22, %v2674_v16  ;;  %v1073_v29 = vrot.slane %v1044_v42, %v2674_v16  ;;  %v2015_v22 = vld [vmem:[%s3005_s4 + $0x18] sm:$0xff] }
 0x5eb   :  { %v2386_v42 = vpack.c.bf16 %v2015_v22, %v2014_v0 }
 0x5ec   :  { %v1088_v30 = vsel %vm818_vm4, %v1069_v27, %v1087_v7  ;;  %v2138_v27 = vld [vmem:[%s3004_s3 + $0x6] ss:$0 sm:$0xff] }
 0x5ed   :  { %v1047_v11 = vpop.permute.xlu0 %1046  ;;  %v1050_v35 = vpop.permute.xlu1 %1049  ;;  %v1089_v39 = vsel %vm820_vm6, %v1073_v29, %v1088_v30 }
 0x5ee   :  { %v1077_v38 = vrot.slane %v1047_v11, %v2674_v16  ;;  %v1081_v40 = vrot.slane %v1050_v35, %v2674_v16  ;;  %v2141_v35 = vld [vmem:[%s3004_s3 + $0x8] ss:$0 sm:$0xff] }
 0x5f0   :  { %v1090_v19 = vsel %vm822_vm5, %v1077_v38, %v1089_v39 }
 0x5f1   :  { %v1642_v43 = vpop.permute.xlu0 %1641  ;;  %v1053_v45 = vpop.permute.xlu1 %1052  ;;  %v1091_v36 = vsel %vm824_vm7, %v1081_v40, %v1090_v19 }
 0x5f2   :  { %v1085_v46 = vrot.slane %v1053_v45, %v2674_v16  ;;  %v1672_v50 = vrot.slane %v1642_v43, %v2674_v16 }
 0x5f4   :  { %v1092_v23 = vsel %vm826_vm8, %v1085_v46, %v1091_v36  ;;  %v1685_v47 = vsel %vm822_vm5, %v1672_v50, %v1684_v44 }
 0x5f5   :  { %v1648_v55 = vpop.permute.xlu0 %1647  ;;  %2276 = vmatmul.mubr.msk.f32.vlgmr.msra.gmra.mrb[8].mxu0 %vm57_vm0, %v1092_v23  ;;  %v1645_v49 = vpop.permute.xlu1 %1644 }
 0x5f6   :  { %v1680_v57 = vrot.slane %v1648_v55, %v2674_v16  ;;  %2284 = vmatpush3.msra.mxu0 %v2567_v4  ;;  %v1676_v58 = vrot.slane %v1645_v49, %v2674_v16  ;;  %2285 = vmatprep.mubr.msk.f32.mxu0 %vm2473_vm9, %v2470_v53  ;;  %v629_v4 = vld [vmem:[%s3006_s5] sm:$0xff] }
 0x5f7   :  { %2367 = vmatprep.subr.bf16.mxu0 %v2366_v21 }
 0x5f8   :  { %v1686_v56 = vsel %vm824_vm7, %v1676_v58, %v1685_v47 }
 0x5f9   :  { %v1687_v59 = vsel %vm826_vm8, %v1680_v57, %v1686_v56 }
 0x5fa   :  { %2286 = vmatmul.mubr.msk.f32.vlgmr.msra.gmra.mrb[10].mxu0 %vm57_vm0, %v1687_v59 }
 0x5fb   :  { %2369 = vmatpush3.bf16.msra.mxu0 %v2366_v21 }
 0x5fc   :  { %2371 = vmatprep.subr.bf16.mxu0 %v2370_v52 }
 0x5ff   :  { %2373 = vmatpush3.bf16.msra.mxu0 %v2370_v52 }
 0x600   :  { %2383 = vmatprep.subr.bf16.mxu0 %v2382_v3 }
 0x6c8   :  { %v1161_v16 = vpop.f32.mrb[8].mxu0 }
 0x6c9   :  { %v2277_v34 = vpop.f32.mrb[9].mxu0  ;;  %2279 = vmatpush3.msra.mxu1 %v1161_v16 }
 0x6ca   :  { %2281 = vmatmul.mubr.msk.f32.vlgmr.msra.gmra.mrb[4].mxu1 %vm57_vm0, %v629_v4  ;;  %2288 = vmatprep.subr.mxu1 %v2470_v53 }
 0x6cb   :  { %2290 = vmatprep.mubr.msk.f32.mxu1 %vm2473_vm9, %v2470_v53  ;;  %v1924_v53 = vld [vmem:[#allocation2 + $0xd8] sm:$0xff] }
 0x6cc   :  { %v2378_v32 = vpack.c.bf16 %v1924_v53, %v1923_v60 }
 0x6cd   :  { %v1756_v12 = vpop.f32.mrb[10].mxu0 }
 0x6ce   :  { %v2287_v5 = vpop.f32.mrb[11].mxu0  ;;  %2289 = vmatpush3.msra.mxu1 %v1756_v12 }
 0x6cf   :  { %2291 = vmatmul.mubr.msk.f32.vlgmr.msra.gmra.mrb[6].mxu1 %vm57_vm0, %v629_v4  ;;  %2375 = vmatprep.subr.bf16.mxu1 %v2374_v1 }
 0x6d0   :  { %2377 = vmatpush3.bf16.msra.mxu1 %v2374_v1 }
 0x6d1   :  { %2379 = vmatprep.subr.bf16.mxu1 %v2378_v32 }
 0x6d4   :  { %2381 = vmatpush3.bf16.msra.mxu1 %v2378_v32 }
 0x79d   :  { %v1234_v2 = vpop.f32.mrb[4].mxu1 }
 0x79e   :  { %v2282_v25 = vpop.f32.mrb[5].mxu1  ;;  %2301 = vmatprep.mubr.msk.f32.mxu0 %vm181_vm1, %v1234_v2 }
 0x7a2   :  { %v1826_v62 = vpop.f32.mrb[6].mxu1 }
 0x7a3   :  { %2302 = vmatmul.mubr.msk.f32.vlgmr.msra.gmra.mrb[12].mxu0 %vm181_vm1, %v1826_v62  ;;  %v2292_v28 = vpop.f32.mrb[7].mxu1 }
 0x7a4   :  { %2385 = vmatpush3.bf16.msra.mxu0 %v2382_v3 }
 0x7a5   :  { %2387 = vmatprep.subr.bf16.mxu0 %v2386_v42 }
 0x7a8   :  { %2389 = vmatpush3.bf16.msra.mxu0 %v2386_v42 }
 0x876   :  { %v2303_v18 = vpop.f32.mrb[12].mxu0 }
 0x877   :  { %v1911_v6 = vpop.f32.mrb[13].mxu0  ;;  %v1917_v8 = vadd.f32 %v2303_v18, %v2135_v14 }
 0x878   :  { %v1912_v51 = vadd.f32 %v2135_v14, %v1911_v6 }
 0x87a   :  { %2312 = vmatprep.mubr.msk.f32.mxu1 %vm181_vm1, %v1912_v51 }
 0x87b   :  { %2313 = vmatmul.mubr.msk.f32.vlgmr.msra.gmra.mrb[8].mxu1 %vm181_vm1, %v1917_v8 }
 0x94e   :  { %v2314_v7 = vpop.f32.mrb[8].mxu1 }
 0x94f   :  { %v2007_v29 = vadd.f32 %v2314_v7, %v2138_v27  ;;  %v2001_v30 = vpop.f32.mrb[9].mxu1 }
 0x950   :  { %v2002_v13 = vadd.f32 %v2138_v27, %v2001_v30 }
 0x951   :  { %v2011_v11 = vmax.f32 %v2007_v29, 0.0 }
 0x952   :  { %v2010_v9 = vmax.f32 %v2002_v13, 0.0 }
 0x954   :  { %2323 = vmatprep.mubr.msk.f32.mxu0 %vm181_vm1, %v2010_v9 }
 0x955   :  { %2324 = vmatmul.mubr.msk.f32.vlgmr.msra.gmra.mrb[14].mxu0 %vm181_vm1, %v2011_v11 }
 0xa28   :  { %v2325_v37 = vpop.f32.mrb[14].mxu0 }
 0xa29   :  { %v2098_v38 = vadd.f32 %v2325_v37, %v2141_v35  ;;  %v2092_v15 = vpop.f32.mrb[15].mxu0 }
 0xa2a   :  { %v2093_v39 = vadd.f32 %v2141_v35, %v2092_v15 }
 0xa2b   :  { %2103 = vst.msk [vmem:[%s3007_s6 + $0x8] sm:$0xff] %vm2101_vm10, %v2098_v38 }
 0xa2c   :  { %2102 = vst.msk [vmem:[%s3007_s6] sm:$0xff] %vm2101_vm10, %v2093_v39 }
 0xa2d   :  { %2108 = vsyncpa [#allocation3], 1 }

</bundles_post_ra>
